<compile_context>
chip_gen: v6e
topology: v6e:2x2x1
jax: 0.10.0
libtpu: 0.0.40
codegen_flags: <defaults>
</compile_context>

<pallas_src>
import functools

import jax
import jax.numpy as jnp
from jax import lax
from jax.experimental import pallas as pl
from jax.experimental.pallas import tpu as pltpu


# ----------------------------------------------------------------------------
# Fused kernel: runs the whole conv/relu stack for B_tile batch elements.
# ----------------------------------------------------------------------------
def _fused_encoder_kernel(*refs, layer_kinds, n_conv, sigmoid, compute_dtype):
    """
    refs layout (pallas_call convention: inputs, then outputs):
      refs[0]                 : x_ref            (B_tile, H, W*Cin0)  lane-dense
      next 2*n_conv           : (wT_ref, b_ref)  per conv layer
                                 wT: (3, W*Cin, W*Cout)  block-Toeplitz, bf16
                                 b : (1, W*Cout)         f32
      next n_layers           : out_ref per layer, (B_tile, H, W*Cout_l)
    """
    n_layers = len(layer_kinds)
    x_ref = refs[0]
    wb_refs = refs[1:1 + 2 * n_conv]
    out_refs = refs[1 + 2 * n_conv:1 + 2 * n_conv + n_layers]

    b_tile, h_dim, wc0 = x_ref.shape
    m_rows = b_tile * h_dim

    # Stack the B_tile images along sublanes -> big-M matmuls.
    x = x_ref[...].reshape(m_rows, wc0).astype(jnp.float32)

    # Per-image H-boundary masks (handle the zero padding in H and keep the
    # row shift from bleeding between stacked images).  Built once, hoisted.
    row = lax.broadcasted_iota(jnp.int32, (m_rows, 1), 0)
    is_top = (row % h_dim) == 0              # first row of each image
    is_bot = (row % h_dim) == (h_dim - 1)    # last row of each image

    ci = 0
    for li, kind in enumerate(layer_kinds):
        if kind == "conv":
            wT_ref = wb_refs[2 * ci]
            b_ref = wb_refs[2 * ci + 1]
            wc_out = wT_ref.shape[2]

            xb = x.astype(compute_dtype)     # bf16 for the MXU only
            r0 = jnp.dot(xb, wT_ref[0], preferred_element_type=jnp.float32)
            r1 = jnp.dot(xb, wT_ref[1], preferred_element_type=jnp.float32)
            r2 = jnp.dot(xb, wT_ref[2], preferred_element_type=jnp.float32)

            # out[h] = R0[h-1] + R1[h] + R2[h+1]   (zeros past the H borders)
            zrow = jnp.zeros((1, wc_out), jnp.float32)
            r0_dn = jnp.concatenate([zrow, r0[:-1, :]], axis=0)   # [i] = r0[i-1]
            r2_up = jnp.concatenate([r2[1:, :], zrow], axis=0)    # [i] = r2[i+1]

            x = (jnp.where(is_top, 0.0, r0_dn)
                 + r1
                 + jnp.where(is_bot, 0.0, r2_up)
                 + b_ref[...].astype(jnp.float32))                # (1, WC) bcast
            ci += 1
        elif kind == "relu":
            x = jnp.maximum(x, 0.0)
        else:
            raise ValueError(f"unsupported layer kind: {kind}")

        out = x
        if sigmoid and li == n_layers - 1:
            out = jax.nn.sigmoid(x)          # EUP; fused epilogue on last output
        out_ref = out_refs[li]
        out_ref[...] = out.reshape(out_ref.shape).astype(out_ref.dtype)


# ----------------------------------------------------------------------------
# Wrapper-side weight preparation: fold kw shifts + W zero padding into a
# block-Toeplitz matrix so the conv becomes 3 lane-dense matmuls.
# ----------------------------------------------------------------------------
def _build_toeplitz(w, W):
    # w: (3, 3, Cin, Cout) HWIO  ->  (3, W*Cin, W*Cout)
    # TODO(synk): for large W (or Cin >= 128) switch to a banded/tiled variant
    # (or a plain (H*W, Cin)@(Cin, Cout) channel contraction) — the dense
    # Toeplitz blow-up scales like W^2/9 in weight bytes.
    mats = []
    for kh in range(3):
        m = None
        for kw in range(3):
            # E[w_in, w_out] = 1  iff  w_in == w_out + kw - 1  (in range)
            E = jnp.eye(W, k=1 - kw, dtype=w.dtype)
            blk = jnp.kron(E, w[kh, kw])
            m = blk if m is None else m + blk
        mats.append(m)
    return jnp.stack(mats, axis=0)


def _pick_batch_tile(n, max_tile=8):
    # Batch several images per grid step (bigger MXU M, fewer pipeline steps)
    # while keeping >= 2 grid steps when possible so v7x's 2 TensorCores both
    # get work.  Returns a divisor of n.
    target = min(max_tile, max(1, n // 2))
    for bt in range(target, 0, -1):
        if n % bt == 0:
            return bt
    return 1


def _estimate_vmem_bytes(b_tile, H, W, c0, out_channels, conv_dims, w_itemsize):
    act = 4  # activations / outputs are f32 in VMEM
    est = 2 * b_tile * H * W * c0 * act                    # input block (x2 buffers)
    for c in out_channels:
        est += 2 * b_tile * H * W * c * act                # output blocks (x2 buffers)
    for cin, cout in conv_dims:
        est += 3 * (W * cin) * (W * cout) * w_itemsize     # Toeplitz (single-buffered)
        est += (W * cout) * 4                              # bias row
    c_max = max([c0] + list(out_channels))
    est += 6 * b_tile * H * W * c_max * act                # live temporaries (rough)
    return est


# ----------------------------------------------------------------------------
# ContentEncoder: applies each layer, returns EVERY intermediate output,
# optionally replaces the last output with sigmoid(last output).
# ----------------------------------------------------------------------------
class ContentEncoder:
    def __init__(self, layers, sigmoid=False, weight_dtype=jnp.bfloat16,
                 max_batch_tile=8):
        # layers: list of dicts {"kind":"conv","w":(3,3,Cin,Cout),"b":(Cout,)}
        #                    or {"kind":"relu"}
        # TODO(synk): the PyTorch module accepts arbitrary nn layers; only the
        # Conv2d(3x3, pad=1)/ReLU/Sigmoid family is kernelized here.
        self.layers = layers
        self.sigmoid = sigmoid
        self.weight_dtype = weight_dtype
        self.max_batch_tile = max_batch_tile

    def __call__(self, x_nchw):
        N, C0, H, W = x_nchw.shape
        dtype = x_nchw.dtype

        b_tile = _pick_batch_tile(N, self.max_batch_tile)
        grid = (N // b_tile,)

        # NCHW -> NHWC -> lane-dense (N, H, W*C)   (layout plumbing only)
        x = jnp.transpose(x_nchw, (0, 2, 3, 1)).reshape(N, H, W * C0)

        layer_kinds, conv_dims, out_channels = [], [], []
        operands = [x]
        in_specs = [pl.BlockSpec((b_tile, H, W * C0), lambda n: (n, 0, 0))]
        c_cur = C0
        for layer in self.layers:
            kind = layer["kind"]
            layer_kinds.append(kind)
            if kind == "conv":
                w, b = layer["w"], layer["b"]
                cin, cout = int(w.shape[2]), int(w.shape[3])
                assert cin == c_cur, "channel mismatch in layer stack"
                conv_dims.append((cin, cout))
                wT = _build_toeplitz(w.astype(jnp.float32), W)
                wT = wT.astype(self.weight_dtype)                   # bf16 on MXU
                b_row = jnp.tile(b.astype(jnp.float32), W).reshape(1, W * cout)
                operands += [wT, b_row]
                # Grid-invariant operands: single-buffer them (index_map is
                # constant, double buffering only wastes VMEM — matters on
                # v7x's 64 MiB).
                in_specs += [
                    pl.BlockSpec((3, W * cin, W * cout), lambda n: (0, 0, 0),
                                 pipeline_mode=pl.Buffered(1)),
                    pl.BlockSpec((1, W * cout), lambda n: (0, 0),
                                 pipeline_mode=pl.Buffered(1)),
                ]
                c_cur = cout
            elif kind == "relu":
                pass
            else:
                raise ValueError(kind)
            out_channels.append(c_cur)

        out_shape = tuple(
            jax.ShapeDtypeStruct((N, H, W * c), dtype) for c in out_channels)
        out_specs = tuple(
            pl.BlockSpec((b_tile, H, W * c), lambda n: (n, 0, 0))
            for c in out_channels)

        # VMEM budget: guard v7x (64 MiB physical) explicitly.
        w_isize = jnp.dtype(self.weight_dtype).itemsize
        est = _estimate_vmem_bytes(b_tile, H, W, C0, out_channels, conv_dims,
                                   w_isize)
        assert est <= 48 * 1024 * 1024, (
            f"estimated VMEM footprint {est/2**20:.1f} MiB exceeds the v7x "
            "budget; reduce batch tile / use the banded-Toeplitz path "
            "(TODO(synk)) for large W*C.")
        vmem_limit = int(min(64 << 20, max(32 << 20, 2 * est)))

        kernel = functools.partial(
            _fused_encoder_kernel,
            layer_kinds=tuple(layer_kinds),
            n_conv=len(conv_dims),
            sigmoid=self.sigmoid,
            compute_dtype=self.weight_dtype)

        outs = pl.pallas_call(
            kernel,
            out_shape=out_shape,
            grid_spec=pltpu.PrefetchScalarGridSpec(
                num_scalar_prefetch=0,
                grid=grid,
                in_specs=in_specs,
                out_specs=out_specs,
            ),
            compiler_params=pltpu.CompilerParams(
                dimension_semantics=("parallel",),
                vmem_limit_bytes=vmem_limit),
        )(*operands)

        # lane-dense (N, H, W*C) -> NCHW (PyTorch output convention)
        return [
            jnp.transpose(o.reshape(N, H, W, c), (0, 3, 1, 2))
            for o, c in zip(outs, out_channels)
        ]


# ----------------------------------------------------------------------------
# Pure-JAX reference (same math, lax.conv, f32 weights) for correctness checks
# ----------------------------------------------------------------------------
def _reference_forward(x_nchw, layers, sigmoid):
    x = jnp.transpose(x_nchw, (0, 2, 3, 1))
    outs = []
    for layer in layers:
        if layer["kind"] == "conv":
            x = lax.conv_general_dilated(
                x, layer["w"], window_strides=(1, 1), padding="SAME",
                dimension_numbers=("NHWC", "HWIO", "NHWC"),
            ) + layer["b"][None, None, None, :]
        else:
            x = jnp.maximum(x, 0.0)
        outs.append(x)
    if sigmoid:
        outs[-1] = jax.nn.sigmoid(outs[-1])
    return [jnp.transpose(o, (0, 3, 1, 2)) for o in outs]


# ----------------------------------------------------------------------------
if __name__ == "__main__":
    key = jax.random.PRNGKey(0)

    # Concrete instantiation of the generic `layers` argument:
    #   Conv2d(4->8, 3x3, pad 1), ReLU, Conv2d(8->8), ReLU, Conv2d(8->4), sigmoid
    channels = [(4, 8), (8, 8), (8, 4)]
    layers = []
    for i, (cin, cout) in enumerate(channels):
        key, kw_, kb_ = jax.random.split(key, 3)
        layers.append({
            "kind": "conv",
            "w": jax.random.normal(kw_, (3, 3, cin, cout), jnp.float32) * 0.1,
            "b": jax.random.normal(kb_, (cout,), jnp.float32) * 0.01,
        })
        if i < len(channels) - 1:
            layers.append({"kind": "relu"})

    encoder = ContentEncoder(layers, sigmoid=True)
    forward = jax.jit(lambda inp: encoder(inp))

    # bf16 weights in the kernel vs f32 reference -> loosened tolerance.
    TOL = dict(atol=2e-2, rtol=2e-2)

    # ---- check 1: N=2 (B_tile=1, 2 parallel grid steps) ----
    key, kx = jax.random.split(key)
    x = jax.random.normal(kx, (2, 4, 16, 16), jnp.float32)  # NCHW, like PyTorch
    outputs = [jax.block_until_ready(o) for o in forward(x)]
    ref = _reference_forward(x, layers, sigmoid=True)
    for o, r in zip(outputs, ref):
        assert o.shape == r.shape and o.dtype == r.dtype
        assert jnp.allclose(o, r, **TOL), "mismatch vs reference (N=2)"

    # ---- check 2: N=8 (B_tile=4 per step -> exercises in-kernel batching
    #      and the per-image boundary masks) ----
    key, kx2 = jax.random.split(key)
    x2 = jax.random.normal(kx2, (8, 4, 16, 16), jnp.float32)
    outputs2 = [jax.block_until_ready(o) for o in forward(x2)]
    ref2 = _reference_forward(x2, layers, sigmoid=True)
    for o, r in zip(outputs2, ref2):
        assert o.shape == r.shape and o.dtype == r.dtype
        assert jnp.allclose(o, r, **TOL), "mismatch vs reference (N=8)"

    print("KERNEL_OK")
</pallas_src>

<mosaic_0001>
module attributes {stable_mosaic.version = 11 : i64} {
  func.func @_fused_encoder_kernel(%arg0: i32, %arg1: memref<1x16x64xf32, #tpu.memory_space<vmem>>, %arg2: memref<3x64x128xbf16, #tpu.memory_space<vmem>>, %arg3: memref<1x128xf32, #tpu.memory_space<vmem>>, %arg4: memref<3x128x128xbf16, #tpu.memory_space<vmem>>, %arg5: memref<1x128xf32, #tpu.memory_space<vmem>>, %arg6: memref<3x128x64xbf16, #tpu.memory_space<vmem>>, %arg7: memref<1x64xf32, #tpu.memory_space<vmem>>, %arg8: memref<1x16x128xf32, #tpu.memory_space<vmem>>, %arg9: memref<1x16x128xf32, #tpu.memory_space<vmem>>, %arg10: memref<1x16x128xf32, #tpu.memory_space<vmem>>, %arg11: memref<1x16x128xf32, #tpu.memory_space<vmem>>, %arg12: memref<1x16x64xf32, #tpu.memory_space<vmem>>) attributes {dimension_semantics = [#tpu.dimension_semantics<parallel>], iteration_bounds = array<i64: 2>, scalar_prefetch = 0 : i64, scratch_operands = 0 : i64, tpu.core_type = #tpu.core_type<tc>, window_params = [{transform_indices = @transform_0, window_bounds = array<i64: 1, 16, 64>}, {pipeline_mode = #tpu.pipeline_mode<synchronous>, transform_indices = @transform_1, window_bounds = array<i64: 3, 64, 128>}, {pipeline_mode = #tpu.pipeline_mode<synchronous>, transform_indices = @transform_2, window_bounds = array<i64: 1, 128>}, {pipeline_mode = #tpu.pipeline_mode<synchronous>, transform_indices = @transform_3, window_bounds = array<i64: 3, 128, 128>}, {pipeline_mode = #tpu.pipeline_mode<synchronous>, transform_indices = @transform_4, window_bounds = array<i64: 1, 128>}, {pipeline_mode = #tpu.pipeline_mode<synchronous>, transform_indices = @transform_5, window_bounds = array<i64: 3, 128, 64>}, {pipeline_mode = #tpu.pipeline_mode<synchronous>, transform_indices = @transform_6, window_bounds = array<i64: 1, 64>}, {transform_indices = @transform_7, window_bounds = array<i64: 1, 16, 128>}, {transform_indices = @transform_8, window_bounds = array<i64: 1, 16, 128>}, {transform_indices = @transform_9, window_bounds = array<i64: 1, 16, 128>}, {transform_indices = @transform_10, window_bounds = array<i64: 1, 16, 128>}, {transform_indices = @transform_11, window_bounds = array<i64: 1, 16, 64>}]} {
    %c0 = arith.constant 0 : index
    %c0_0 = arith.constant 0 : index
    %c0_1 = arith.constant 0 : index
    %0 = vector.load %arg1[%c0, %c0_0, %c0_1] : memref<1x16x64xf32, #tpu.memory_space<vmem>>, vector<1x16x64xf32>
    %1 = vector.shape_cast %0 : vector<1x16x64xf32> to vector<16x64xf32>
    %2 = tpu.iota {dimensions = array<i32: 0>} : vector<16x1xi32>
    %c16_i32 = arith.constant 16 : i32
    %c0_i32 = arith.constant 0 : i32
    %3 = arith.cmpi eq, %c16_i32, %c0_i32 : i32
    %c1_i32 = arith.constant 1 : i32
    %4 = arith.select %3, %c1_i32, %c16_i32 : i32
    %5 = vector.broadcast %4 : i32 to vector<16x1xi32>
    %6 = arith.remsi %2, %5 : vector<16x1xi32>
    %c0_i32_2 = arith.constant 0 : i32
    %7 = vector.broadcast %c0_i32_2 : i32 to vector<16x1xi32>
    %8 = arith.cmpi ne, %6, %7 : vector<16x1xi32>
    %c0_i32_3 = arith.constant 0 : i32
    %9 = vector.broadcast %c0_i32_3 : i32 to vector<16x1xi32>
    %10 = arith.cmpi slt, %6, %9 : vector<16x1xi32>
    %c0_i32_4 = arith.constant 0 : i32
    %11 = arith.cmpi slt, %4, %c0_i32_4 : i32
    %12 = vector.broadcast %11 : i1 to vector<16x1xi1>
    %13 = vector.broadcast %12 : vector<16x1xi1> to vector<16x1xi1>
    %14 = arith.xori %10, %13 : vector<16x1xi1>
    %15 = arith.andi %14, %8 : vector<16x1xi1>
    %16 = vector.broadcast %4 : i32 to vector<16x1xi32>
    %17 = arith.addi %6, %16 : vector<16x1xi32>
    %18 = arith.select %15, %17, %6 : vector<16x1xi1>, vector<16x1xi32>
    %c0_i32_5 = arith.constant 0 : i32
    %19 = vector.broadcast %c0_i32_5 : i32 to vector<16x1xi32>
    %20 = arith.cmpi eq, %18, %19 : vector<16x1xi32>
    %c16_i32_6 = arith.constant 16 : i32
    %c0_i32_7 = arith.constant 0 : i32
    %21 = arith.cmpi eq, %c16_i32_6, %c0_i32_7 : i32
    %c1_i32_8 = arith.constant 1 : i32
    %22 = arith.select %21, %c1_i32_8, %c16_i32_6 : i32
    %23 = vector.broadcast %22 : i32 to vector<16x1xi32>
    %24 = arith.remsi %2, %23 : vector<16x1xi32>
    %c0_i32_9 = arith.constant 0 : i32
    %25 = vector.broadcast %c0_i32_9 : i32 to vector<16x1xi32>
    %26 = arith.cmpi ne, %24, %25 : vector<16x1xi32>
    %c0_i32_10 = arith.constant 0 : i32
    %27 = vector.broadcast %c0_i32_10 : i32 to vector<16x1xi32>
    %28 = arith.cmpi slt, %24, %27 : vector<16x1xi32>
    %c0_i32_11 = arith.constant 0 : i32
    %29 = arith.cmpi slt, %22, %c0_i32_11 : i32
    %30 = vector.broadcast %29 : i1 to vector<16x1xi1>
    %31 = vector.broadcast %30 : vector<16x1xi1> to vector<16x1xi1>
    %32 = arith.xori %28, %31 : vector<16x1xi1>
    %33 = arith.andi %32, %26 : vector<16x1xi1>
    %34 = vector.broadcast %22 : i32 to vector<16x1xi32>
    %35 = arith.addi %24, %34 : vector<16x1xi32>
    %36 = arith.select %33, %35, %24 : vector<16x1xi1>, vector<16x1xi32>
    %c15_i32 = arith.constant 15 : i32
    %37 = vector.broadcast %c15_i32 : i32 to vector<16x1xi32>
    %38 = arith.cmpi eq, %36, %37 : vector<16x1xi32>
    %39 = arith.truncf %1 : vector<16x64xf32> to vector<16x64xbf16>
    %c0_12 = arith.constant 0 : index
    %c0_13 = arith.constant 0 : index
    %c0_14 = arith.constant 0 : index
    %40 = vector.load %arg2[%c0_12, %c0_13, %c0_14] : memref<3x64x128xbf16, #tpu.memory_space<vmem>>, vector<1x64x128xbf16>
    %41 = vector.shape_cast %40 : vector<1x64x128xbf16> to vector<64x128xbf16>
    %cst = arith.constant dense<0.000000e+00> : vector<16x128xf32>
    %42 = tpu.matmul %39, %41, %cst {dimension_numbers = #tpu.dot_dimension_numbers<[1], [0], [0], [1], [0, 0, 1, 1], [], []>} : vector<16x64xbf16>, vector<64x128xbf16>, vector<16x128xf32> -> vector<16x128xf32>
    %c1 = arith.constant 1 : index
    %c0_15 = arith.constant 0 : index
    %c0_16 = arith.constant 0 : index
    %43 = vector.load %arg2[%c1, %c0_15, %c0_16] : memref<3x64x128xbf16, #tpu.memory_space<vmem>>, vector<1x64x128xbf16>
    %44 = vector.shape_cast %43 : vector<1x64x128xbf16> to vector<64x128xbf16>
    %cst_17 = arith.constant dense<0.000000e+00> : vector<16x128xf32>
    %45 = tpu.matmul %39, %44, %cst_17 {dimension_numbers = #tpu.dot_dimension_numbers<[1], [0], [0], [1], [0, 0, 1, 1], [], []>} : vector<16x64xbf16>, vector<64x128xbf16>, vector<16x128xf32> -> vector<16x128xf32>
    %c2 = arith.constant 2 : index
    %c0_18 = arith.constant 0 : index
    %c0_19 = arith.constant 0 : index
    %46 = vector.load %arg2[%c2, %c0_18, %c0_19] : memref<3x64x128xbf16, #tpu.memory_space<vmem>>, vector<1x64x128xbf16>
    %47 = vector.shape_cast %46 : vector<1x64x128xbf16> to vector<64x128xbf16>
    %cst_20 = arith.constant dense<0.000000e+00> : vector<16x128xf32>
    %48 = tpu.matmul %39, %47, %cst_20 {dimension_numbers = #tpu.dot_dimension_numbers<[1], [0], [0], [1], [0, 0, 1, 1], [], []>} : vector<16x64xbf16>, vector<64x128xbf16>, vector<16x128xf32> -> vector<16x128xf32>
    %cst_21 = arith.constant 0.000000e+00 : f32
    %49 = vector.broadcast %cst_21 : f32 to vector<1x128xf32>
    %50 = vector.extract_strided_slice %42 {offsets = [0, 0], sizes = [15, 128], strides = [1, 1]} : vector<16x128xf32> to vector<15x128xf32>
    %51 = tpu.concatenate %49, %50 in 0 : vector<1x128xf32>, vector<15x128xf32> -> vector<16x128xf32>
    %52 = vector.extract_strided_slice %48 {offsets = [1, 0], sizes = [15, 128], strides = [1, 1]} : vector<16x128xf32> to vector<15x128xf32>
    %53 = tpu.concatenate %52, %49 in 0 : vector<15x128xf32>, vector<1x128xf32> -> vector<16x128xf32>
    %cst_22 = arith.constant 0.000000e+00 : f32
    %54 = vector.shape_cast %20 : vector<16x1xi1> to vector<16x1xi1>
    %55 = vector.broadcast %54 : vector<16x1xi1> to vector<16x128xi1>
    %56 = vector.broadcast %cst_22 : f32 to vector<16x128xf32>
    %57 = arith.select %55, %56, %51 : vector<16x128xi1>, vector<16x128xf32>
    %58 = arith.addf %57, %45 : vector<16x128xf32>
    %cst_23 = arith.constant 0.000000e+00 : f32
    %59 = vector.shape_cast %38 : vector<16x1xi1> to vector<16x1xi1>
    %60 = vector.broadcast %59 : vector<16x1xi1> to vector<16x128xi1>
    %61 = vector.broadcast %cst_23 : f32 to vector<16x128xf32>
    %62 = arith.select %60, %61, %53 : vector<16x128xi1>, vector<16x128xf32>
    %63 = arith.addf %58, %62 : vector<16x128xf32>
    %c0_24 = arith.constant 0 : index
    %c0_25 = arith.constant 0 : index
    %64 = vector.load %arg3[%c0_24, %c0_25] : memref<1x128xf32, #tpu.memory_space<vmem>>, vector<1x128xf32>
    %65 = vector.broadcast %64 : vector<1x128xf32> to vector<16x128xf32>
    %66 = arith.addf %63, %65 : vector<16x128xf32>
    %67 = vector.shape_cast %66 : vector<16x128xf32> to vector<1x16x128xf32>
    %c0_26 = arith.constant 0 : index
    %c0_27 = arith.constant 0 : index
    %c0_28 = arith.constant 0 : index
    %68 = vector.load %arg8[%c0_26, %c0_27, %c0_28] : memref<1x16x128xf32, #tpu.memory_space<vmem>>, vector<1x16x128xf32>
    tpu.vector_store %arg8[%c0_26, %c0_27, %c0_28], %67 {strides = array<i32>} : memref<1x16x128xf32, #tpu.memory_space<vmem>>, vector<1x16x128xf32>,
    %cst_29 = arith.constant 0.000000e+00 : f32
    %69 = vector.broadcast %cst_29 : f32 to vector<16x128xf32>
    %70 = arith.maximumf %66, %69 : vector<16x128xf32>
    %71 = vector.shape_cast %70 : vector<16x128xf32> to vector<1x16x128xf32>
    %c0_30 = arith.constant 0 : index
    %c0_31 = arith.constant 0 : index
    %c0_32 = arith.constant 0 : index
    %72 = vector.load %arg9[%c0_30, %c0_31, %c0_32] : memref<1x16x128xf32, #tpu.memory_space<vmem>>, vector<1x16x128xf32>
    tpu.vector_store %arg9[%c0_30, %c0_31, %c0_32], %71 {strides = array<i32>} : memref<1x16x128xf32, #tpu.memory_space<vmem>>, vector<1x16x128xf32>,
    %73 = arith.truncf %70 : vector<16x128xf32> to vector<16x128xbf16>
    %c0_33 = arith.constant 0 : index
    %c0_34 = arith.constant 0 : index
    %c0_35 = arith.constant 0 : index
    %74 = vector.load %arg4[%c0_33, %c0_34, %c0_35] : memref<3x128x128xbf16, #tpu.memory_space<vmem>>, vector<1x128x128xbf16>
    %75 = vector.shape_cast %74 : vector<1x128x128xbf16> to vector<128x128xbf16>
    %cst_36 = arith.constant dense<0.000000e+00> : vector<16x128xf32>
    %76 = tpu.matmul %73, %75, %cst_36 {dimension_numbers = #tpu.dot_dimension_numbers<[1], [0], [0], [1], [0, 0, 1, 1], [], []>} : vector<16x128xbf16>, vector<128x128xbf16>, vector<16x128xf32> -> vector<16x128xf32>
    %c1_37 = arith.constant 1 : index
    %c0_38 = arith.constant 0 : index
    %c0_39 = arith.constant 0 : index
    %77 = vector.load %arg4[%c1_37, %c0_38, %c0_39] : memref<3x128x128xbf16, #tpu.memory_space<vmem>>, vector<1x128x128xbf16>
    %78 = vector.shape_cast %77 : vector<1x128x128xbf16> to vector<128x128xbf16>
    %cst_40 = arith.constant dense<0.000000e+00> : vector<16x128xf32>
    %79 = tpu.matmul %73, %78, %cst_40 {dimension_numbers = #tpu.dot_dimension_numbers<[1], [0], [0], [1], [0, 0, 1, 1], [], []>} : vector<16x128xbf16>, vector<128x128xbf16>, vector<16x128xf32> -> vector<16x128xf32>
    %c2_41 = arith.constant 2 : index
    %c0_42 = arith.constant 0 : index
    %c0_43 = arith.constant 0 : index
    %80 = vector.load %arg4[%c2_41, %c0_42, %c0_43] : memref<3x128x128xbf16, #tpu.memory_space<vmem>>, vector<1x128x128xbf16>
    %81 = vector.shape_cast %80 : vector<1x128x128xbf16> to vector<128x128xbf16>
    %cst_44 = arith.constant dense<0.000000e+00> : vector<16x128xf32>
    %82 = tpu.matmul %73, %81, %cst_44 {dimension_numbers = #tpu.dot_dimension_numbers<[1], [0], [0], [1], [0, 0, 1, 1], [], []>} : vector<16x128xbf16>, vector<128x128xbf16>, vector<16x128xf32> -> vector<16x128xf32>
    %cst_45 = arith.constant 0.000000e+00 : f32
    %83 = vector.broadcast %cst_45 : f32 to vector<1x128xf32>
    %84 = vector.extract_strided_slice %76 {offsets = [0, 0], sizes = [15, 128], strides = [1, 1]} : vector<16x128xf32> to vector<15x128xf32>
    %85 = tpu.concatenate %83, %84 in 0 : vector<1x128xf32>, vector<15x128xf32> -> vector<16x128xf32>
    %86 = vector.extract_strided_slice %82 {offsets = [1, 0], sizes = [15, 128], strides = [1, 1]} : vector<16x128xf32> to vector<15x128xf32>
    %87 = tpu.concatenate %86, %83 in 0 : vector<15x128xf32>, vector<1x128xf32> -> vector<16x128xf32>
    %cst_46 = arith.constant 0.000000e+00 : f32
    %88 = vector.shape_cast %20 : vector<16x1xi1> to vector<16x1xi1>
    %89 = vector.broadcast %88 : vector<16x1xi1> to vector<16x128xi1>
    %90 = vector.broadcast %cst_46 : f32 to vector<16x128xf32>
    %91 = arith.select %89, %90, %85 : vector<16x128xi1>, vector<16x128xf32>
    %92 = arith.addf %91, %79 : vector<16x128xf32>
    %cst_47 = arith.constant 0.000000e+00 : f32
    %93 = vector.shape_cast %38 : vector<16x1xi1> to vector<16x1xi1>
    %94 = vector.broadcast %93 : vector<16x1xi1> to vector<16x128xi1>
    %95 = vector.broadcast %cst_47 : f32 to vector<16x128xf32>
    %96 = arith.select %94, %95, %87 : vector<16x128xi1>, vector<16x128xf32>
    %97 = arith.addf %92, %96 : vector<16x128xf32>
    %c0_48 = arith.constant 0 : index
    %c0_49 = arith.constant 0 : index
    %98 = vector.load %arg5[%c0_48, %c0_49] : memref<1x128xf32, #tpu.memory_space<vmem>>, vector<1x128xf32>
    %99 = vector.broadcast %98 : vector<1x128xf32> to vector<16x128xf32>
    %100 = arith.addf %97, %99 : vector<16x128xf32>
    %101 = vector.shape_cast %100 : vector<16x128xf32> to vector<1x16x128xf32>
    %c0_50 = arith.constant 0 : index
    %c0_51 = arith.constant 0 : index
    %c0_52 = arith.constant 0 : index
    %102 = vector.load %arg10[%c0_50, %c0_51, %c0_52] : memref<1x16x128xf32, #tpu.memory_space<vmem>>, vector<1x16x128xf32>
    tpu.vector_store %arg10[%c0_50, %c0_51, %c0_52], %101 {strides = array<i32>} : memref<1x16x128xf32, #tpu.memory_space<vmem>>, vector<1x16x128xf32>,
    %cst_53 = arith.constant 0.000000e+00 : f32
    %103 = vector.broadcast %cst_53 : f32 to vector<16x128xf32>
    %104 = arith.maximumf %100, %103 : vector<16x128xf32>
    %105 = vector.shape_cast %104 : vector<16x128xf32> to vector<1x16x128xf32>
    %c0_54 = arith.constant 0 : index
    %c0_55 = arith.constant 0 : index
    %c0_56 = arith.constant 0 : index
    %106 = vector.load %arg11[%c0_54, %c0_55, %c0_56] : memref<1x16x128xf32, #tpu.memory_space<vmem>>, vector<1x16x128xf32>
    tpu.vector_store %arg11[%c0_54, %c0_55, %c0_56], %105 {strides = array<i32>} : memref<1x16x128xf32, #tpu.memory_space<vmem>>, vector<1x16x128xf32>,
    %107 = arith.truncf %104 : vector<16x128xf32> to vector<16x128xbf16>
    %c0_57 = arith.constant 0 : index
    %c0_58 = arith.constant 0 : index
    %c0_59 = arith.constant 0 : index
    %108 = vector.load %arg6[%c0_57, %c0_58, %c0_59] : memref<3x128x64xbf16, #tpu.memory_space<vmem>>, vector<1x128x64xbf16>
    %109 = vector.shape_cast %108 : vector<1x128x64xbf16> to vector<128x64xbf16>
    %cst_60 = arith.constant dense<0.000000e+00> : vector<16x64xf32>
    %110 = tpu.matmul %107, %109, %cst_60 {dimension_numbers = #tpu.dot_dimension_numbers<[1], [0], [0], [1], [0, 0, 1, 1], [], []>} : vector<16x128xbf16>, vector<128x64xbf16>, vector<16x64xf32> -> vector<16x64xf32>
    %c1_61 = arith.constant 1 : index
    %c0_62 = arith.constant 0 : index
    %c0_63 = arith.constant 0 : index
    %111 = vector.load %arg6[%c1_61, %c0_62, %c0_63] : memref<3x128x64xbf16, #tpu.memory_space<vmem>>, vector<1x128x64xbf16>
    %112 = vector.shape_cast %111 : vector<1x128x64xbf16> to vector<128x64xbf16>
    %cst_64 = arith.constant dense<0.000000e+00> : vector<16x64xf32>
    %113 = tpu.matmul %107, %112, %cst_64 {dimension_numbers = #tpu.dot_dimension_numbers<[1], [0], [0], [1], [0, 0, 1, 1], [], []>} : vector<16x128xbf16>, vector<128x64xbf16>, vector<16x64xf32> -> vector<16x64xf32>
    %c2_65 = arith.constant 2 : index
    %c0_66 = arith.constant 0 : index
    %c0_67 = arith.constant 0 : index
    %114 = vector.load %arg6[%c2_65, %c0_66, %c0_67] : memref<3x128x64xbf16, #tpu.memory_space<vmem>>, vector<1x128x64xbf16>
    %115 = vector.shape_cast %114 : vector<1x128x64xbf16> to vector<128x64xbf16>
    %cst_68 = arith.constant dense<0.000000e+00> : vector<16x64xf32>
    %116 = tpu.matmul %107, %115, %cst_68 {dimension_numbers = #tpu.dot_dimension_numbers<[1], [0], [0], [1], [0, 0, 1, 1], [], []>} : vector<16x128xbf16>, vector<128x64xbf16>, vector<16x64xf32> -> vector<16x64xf32>
    %cst_69 = arith.constant 0.000000e+00 : f32
    %117 = vector.broadcast %cst_69 : f32 to vector<1x64xf32>
    %118 = vector.extract_strided_slice %110 {offsets = [0, 0], sizes = [15, 64], strides = [1, 1]} : vector<16x64xf32> to vector<15x64xf32>
    %119 = tpu.concatenate %117, %118 in 0 : vector<1x64xf32>, vector<15x64xf32> -> vector<16x64xf32>
    %120 = vector.extract_strided_slice %116 {offsets = [1, 0], sizes = [15, 64], strides = [1, 1]} : vector<16x64xf32> to vector<15x64xf32>
    %121 = tpu.concatenate %120, %117 in 0 : vector<15x64xf32>, vector<1x64xf32> -> vector<16x64xf32>
    %cst_70 = arith.constant 0.000000e+00 : f32
    %122 = vector.shape_cast %20 : vector<16x1xi1> to vector<16x1xi1>
    %123 = vector.broadcast %122 : vector<16x1xi1> to vector<16x64xi1>
    %124 = vector.broadcast %cst_70 : f32 to vector<16x64xf32>
    %125 = arith.select %123, %124, %119 : vector<16x64xi1>, vector<16x64xf32>
    %126 = arith.addf %125, %113 : vector<16x64xf32>
    %cst_71 = arith.constant 0.000000e+00 : f32
    %127 = vector.shape_cast %38 : vector<16x1xi1> to vector<16x1xi1>
    %128 = vector.broadcast %127 : vector<16x1xi1> to vector<16x64xi1>
    %129 = vector.broadcast %cst_71 : f32 to vector<16x64xf32>
    %130 = arith.select %128, %129, %121 : vector<16x64xi1>, vector<16x64xf32>
    %131 = arith.addf %126, %130 : vector<16x64xf32>
    %c0_72 = arith.constant 0 : index
    %c0_73 = arith.constant 0 : index
    %132 = vector.load %arg7[%c0_72, %c0_73] : memref<1x64xf32, #tpu.memory_space<vmem>>, vector<1x64xf32>
    %133 = vector.broadcast %132 : vector<1x64xf32> to vector<16x64xf32>
    %134 = arith.addf %131, %133 : vector<16x64xf32>
    %135 = arith.negf %134 : vector<16x64xf32>
    %136 = math.exp %135 : vector<16x64xf32>
    %cst_74 = arith.constant 1.000000e+00 : f32
    %137 = vector.broadcast %cst_74 : f32 to vector<16x64xf32>
    %138 = arith.addf %137, %136 : vector<16x64xf32>
    %139 = arith.divf %137, %138 : vector<16x64xf32>
    %140 = vector.shape_cast %139 : vector<16x64xf32> to vector<1x16x64xf32>
    %c0_75 = arith.constant 0 : index
    %c0_76 = arith.constant 0 : index
    %c0_77 = arith.constant 0 : index
    %141 = vector.load %arg12[%c0_75, %c0_76, %c0_77] : memref<1x16x64xf32, #tpu.memory_space<vmem>>, vector<1x16x64xf32>
    tpu.vector_store %arg12[%c0_75, %c0_76, %c0_77], %140 {strides = array<i32>} : memref<1x16x64xf32, #tpu.memory_space<vmem>>, vector<1x16x64xf32>,
    return
  }
  func.func @transform_0(%arg0: i32) -> (i32, i32, i32) {
    %c0_i32 = arith.constant 0 : i32
    %c0_i32_0 = arith.constant 0 : i32
    %c0_i32_1 = arith.constant 0 : i32
    return %arg0, %c0_i32, %c0_i32_0 : i32, i32, i32
  }
  func.func @transform_1(%arg0: i32) -> (i32, i32, i32) {
    %c0_i32 = arith.constant 0 : i32
    %c0_i32_0 = arith.constant 0 : i32
    %c0_i32_1 = arith.constant 0 : i32
    %c0_i32_2 = arith.constant 0 : i32
    return %c0_i32, %c0_i32_0, %c0_i32_1 : i32, i32, i32
  }
  func.func @transform_2(%arg0: i32) -> (i32, i32) {
    %c0_i32 = arith.constant 0 : i32
    %c0_i32_0 = arith.constant 0 : i32
    %c0_i32_1 = arith.constant 0 : i32
    return %c0_i32, %c0_i32_0 : i32, i32
  }
  func.func @transform_3(%arg0: i32) -> (i32, i32, i32) {
    %c0_i32 = arith.constant 0 : i32
    %c0_i32_0 = arith.constant 0 : i32
    %c0_i32_1 = arith.constant 0 : i32
    %c0_i32_2 = arith.constant 0 : i32
    return %c0_i32, %c0_i32_0, %c0_i32_1 : i32, i32, i32
  }
  func.func @transform_4(%arg0: i32) -> (i32, i32) {
    %c0_i32 = arith.constant 0 : i32
    %c0_i32_0 = arith.constant 0 : i32
    %c0_i32_1 = arith.constant 0 : i32
    return %c0_i32, %c0_i32_0 : i32, i32
  }
  func.func @transform_5(%arg0: i32) -> (i32, i32, i32) {
    %c0_i32 = arith.constant 0 : i32
    %c0_i32_0 = arith.constant 0 : i32
    %c0_i32_1 = arith.constant 0 : i32
    %c0_i32_2 = arith.constant 0 : i32
    return %c0_i32, %c0_i32_0, %c0_i32_1 : i32, i32, i32
  }
  func.func @transform_6(%arg0: i32) -> (i32, i32) {
    %c0_i32 = arith.constant 0 : i32
    %c0_i32_0 = arith.constant 0 : i32
    %c0_i32_1 = arith.constant 0 : i32
    return %c0_i32, %c0_i32_0 : i32, i32
  }
  func.func @transform_7(%arg0: i32) -> (i32, i32, i32) {
    %c0_i32 = arith.constant 0 : i32
    %c0_i32_0 = arith.constant 0 : i32
    %c0_i32_1 = arith.constant 0 : i32
    return %arg0, %c0_i32, %c0_i32_0 : i32, i32, i32
  }
  func.func @transform_8(%arg0: i32) -> (i32, i32, i32) {
    %c0_i32 = arith.constant 0 : i32
    %c0_i32_0 = arith.constant 0 : i32
    %c0_i32_1 = arith.constant 0 : i32
    return %arg0, %c0_i32, %c0_i32_0 : i32, i32, i32
  }
  func.func @transform_9(%arg0: i32) -> (i32, i32, i32) {
    %c0_i32 = arith.constant 0 : i32
    %c0_i32_0 = arith.constant 0 : i32
    %c0_i32_1 = arith.constant 0 : i32
    return %arg0, %c0_i32, %c0_i32_0 : i32, i32, i32
  }
  func.func @transform_10(%arg0: i32) -> (i32, i32, i32) {
    %c0_i32 = arith.constant 0 : i32
    %c0_i32_0 = arith.constant 0 : i32
    %c0_i32_1 = arith.constant 0 : i32
    return %arg0, %c0_i32, %c0_i32_0 : i32, i32, i32
  }
  func.func @transform_11(%arg0: i32) -> (i32, i32, i32) {
    %c0_i32 = arith.constant 0 : i32
    %c0_i32_0 = arith.constant 0 : i32
    %c0_i32_1 = arith.constant 0 : i32
    return %arg0, %c0_i32, %c0_i32_0 : i32, i32, i32
  }
}

</mosaic_0001>

<bundles_post_ra>
// kernel: tile.14
= control target key start
LH: loop header
LB: loop body
LE: loop exit
PB: predicated region body
PF: predicated region fallthrough
CT: control target
= control target key end

     0   :  { %s28_s0 = inlined_call_operand.vmem [shape: f32[8], index: 0, kind: input, shape index: {}]   ;;  %s29_s1 = inlined_call_operand.vmem [shape: f32[16,8], index: 1, kind: output, shape index: {}]  }
   0x1   :  { %v4_v0 = vld [vmem:[%s28_s0] ss:$0 sm:$0xff] }
   0x2   :  { %5 = vst [vmem:[%s29_s1] sm:$0xff] %v4_v0  ;;  %8 = vst [vmem:[%s29_s1 + $0x8] sm:$0xff] %v4_v0 }

// kernel: tile.15
= control target key start
LH: loop header
LB: loop body
LE: loop exit
PB: predicated region body
PF: predicated region fallthrough
CT: control target
= control target key end

     0   :  { %s133_s10 = smov 120   ;;  %s134_s11 = smov 104   ;;  %vm3_vm0 = vcmask 64512   ;;  %vm9_vm1 = vcmask 1048512   ;;  %vm15_vm2 = vcmask 982912   ;;  %vm21_vm3 = vcmask 917312   ;;  %s209_s0 = inlined_call_operand.vmem [shape: f32[16,8], index: 0, kind: input, shape index: {}]   ;;  %s210_s1 = inlined_call_operand.vmem [shape: f32[1,128], index: 1, kind: output, shape index: {}]  }
   0x1   :  { %v103_v0 = vld [vmem:[%s209_s0 + $0xf] sm:$0x1]   ;;  %v105_v1 = vld [vmem:[%s209_s0 + $0xd] sm:$0x1]   ;;  %v104_v2 = vld [vmem:[%s209_s0 + $0xe] sm:$0x1]  }
   0x2   :  { %7 = vrot.lane.b32.xlu0 %v103_v0, %s133_s10  ;;  %19 = vrot.lane.b32.xlu1 %v105_v1, %s134_s11  ;;  %v106_v3 = vld [vmem:[%s209_s0 + $0xc] sm:$0x1]   ;;  %s135_s16 = smov 112   ;;  %s136_s17 = smov 96   ;;  %v107_v4 = vld [vmem:[%s209_s0 + $0xb] sm:$0x1]  }
   0x3   :  { %v108_v5 = vld [vmem:[%s209_s0 + $0xa] sm:$0x1]   ;;  %v2_v6 = vld [vmem:[%s209_s0] sm:$0x1]   ;;  %s137_s24 = smov 88   ;;  %s138_s25 = smov 80  }
   0x4   :  { %4 = vst.msk [vmem:[#allocation0] sm:$0x1] %vm3_vm0, %v2_v6   ;;  %v109_v7 = vld [vmem:[%s209_s0 + $0x9] sm:$0x1]   ;;  %v110_v8 = vld [vmem:[%s209_s0 + $0x8] sm:$0x1]  }
   0x5   :  { %s139_s30 = smov 72   ;;  %s140_s2 = smov 64   ;;  %v111_v9 = vld [vmem:[%s209_s0 + $0x7] sm:$0x1]   ;;  %v112_v10 = vld [vmem:[%s209_s0 + $0x6] sm:$0x1]  }
   0x6   :  { %13 = vrot.lane.b32.xlu0 %v104_v2, %s135_s16  ;;  %25 = vrot.lane.b32.xlu1 %v106_v3, %s136_s17  ;;  %s141_s7 = smov 56   ;;  %s142_s8 = smov 48   ;;  %v113_v11 = vld [vmem:[%s209_s0 + $0x5] sm:$0x1]   ;;  %v114_v12 = vld [vmem:[%s209_s0 + $0x4] sm:$0x1]  }
   0x7   :  { %s143_s13 = smov 40   ;;  %s144_s14 = smov 32   ;;  %v115_v13 = vld [vmem:[%s209_s0 + $0x3] sm:$0x1]   ;;  %v116_v14 = vld [vmem:[%s209_s0 + $0x2] sm:$0x1]  }
   0x8   :  { %s145_s19 = smov 24   ;;  %s146_s20 = smov 16   ;;  %v117_v15 = vld [vmem:[%s209_s0 + $0x1] sm:$0x1]   ;;  %vm27_vm4 = vcmask 851712   ;;  %vm33_vm5 = vcmask 786112  }
   0x9   :  { %s147_s0 = smov 8   ;;  %vm39_vm6 = vcmask 720512   ;;  %vm45_vm7 = vcmask 654912   ;;  %vm51_vm8 = vcmask 589312   ;;  %vm57_vm9 = vcmask 523712  }
   0xa   :  { %31 = vrot.lane.b32.xlu0 %v107_v4, %s137_s24  ;;  %37 = vrot.lane.b32.xlu1 %v108_v5, %s138_s25  ;;  %vm63_vm10 = vcmask 458112   ;;  %vm69_vm11 = vcmask 392512   ;;  %vm75_vm12 = vcmask 326912   ;;  %vm81_vm13 = vcmask 261312  }
   0xb   :  { %vm87_vm14 = vcmask 195712   ;;  %vm93_vm15 = vcmask 130112  }
   0xe   :  { %43 = vrot.lane.b32.xlu0 %v109_v7, %s139_s30  ;;  %49 = vrot.lane.b32.xlu1 %v110_v8, %s140_s2 }
  0x12   :  { %55 = vrot.lane.b32.xlu0 %v111_v9, %s141_s7  ;;  %61 = vrot.lane.b32.xlu1 %v112_v10, %s142_s8 }
  0x16   :  { %67 = vrot.lane.b32.xlu0 %v113_v11, %s143_s13  ;;  %73 = vrot.lane.b32.xlu1 %v114_v12, %s144_s14 }
  0x1a   :  { %79 = vrot.lane.b32.xlu0 %v115_v13, %s145_s19  ;;  %85 = vrot.lane.b32.xlu1 %v116_v14, %s146_s20 }
  0x1e   :  { %91 = vrot.lane.b32.xlu0 %v117_v15, %s147_s0 }
  0x74   :  { %v8_v16 = vpop.permute.xlu0 %7   ;;  %v20_v17 = vpop.permute.xlu1 %19  }
  0x75   :  { %10 = vst.msk [vmem:[#allocation0] sm:$0x1] %vm9_vm1, %v8_v16  }
  0x78   :  { %v14_v18 = vpop.permute.xlu0 %13   ;;  %v26_v19 = vpop.permute.xlu1 %25  }
  0x79   :  { %16 = vst.msk [vmem:[#allocation0] sm:$0x1] %vm15_vm2, %v14_v18  }
  0x7a   :  { %22 = vst.msk [vmem:[#allocation0] sm:$0x1] %vm21_vm3, %v20_v17  }
  0x7b   :  { %28 = vst.msk [vmem:[#allocation0] sm:$0x1] %vm27_vm4, %v26_v19  }
  0x7c   :  { %v32_v20 = vpop.permute.xlu0 %31   ;;  %v38_v21 = vpop.permute.xlu1 %37  }
  0x7d   :  { %34 = vst.msk [vmem:[#allocation0] sm:$0x1] %vm33_vm5, %v32_v20  }
  0x7e   :  { %40 = vst.msk [vmem:[#allocation0] sm:$0x1] %vm39_vm6, %v38_v21  }
  0x80   :  { %v44_v22 = vpop.permute.xlu0 %43   ;;  %v50_v23 = vpop.permute.xlu1 %49  }
  0x81   :  { %46 = vst.msk [vmem:[#allocation0] sm:$0x1] %vm45_vm7, %v44_v22  }
  0x82   :  { %52 = vst.msk [vmem:[#allocation0] sm:$0x1] %vm51_vm8, %v50_v23  }
  0x84   :  { %v56_v24 = vpop.permute.xlu0 %55   ;;  %v62_v25 = vpop.permute.xlu1 %61  }
  0x85   :  { %58 = vst.msk [vmem:[#allocation0] sm:$0x1] %vm57_vm9, %v56_v24  }
  0x86   :  { %64 = vst.msk [vmem:[#allocation0] sm:$0x1] %vm63_vm10, %v62_v25  }
  0x88   :  { %v68_v26 = vpop.permute.xlu0 %67   ;;  %v74_v27 = vpop.permute.xlu1 %73  }
  0x89   :  { %70 = vst.msk [vmem:[#allocation0] sm:$0x1] %vm69_vm11, %v68_v26  }
  0x8a   :  { %76 = vst.msk [vmem:[#allocation0] sm:$0x1] %vm75_vm12, %v74_v27  }
  0x8c   :  { %v80_v28 = vpop.permute.xlu0 %79   ;;  %v86_v29 = vpop.permute.xlu1 %85  }
  0x8d   :  { %82 = vst.msk [vmem:[#allocation0] sm:$0x1] %vm81_vm13, %v80_v28  }
  0x8e   :  { %88 = vst.msk [vmem:[#allocation0] sm:$0x1] %vm87_vm14, %v86_v29  }
  0x90   :  { %v92_v30 = vpop.permute.xlu0 %91  }
  0x91   :  { %94 = vst.msk [vmem:[#allocation0] sm:$0x1] %vm93_vm15, %v92_v30  }
  0x98   :  { %v99_v31 = vld [vmem:[#allocation0] sm:$0x1] }
  0x99   :  { %102 = vst [vmem:[%s210_s1] sm:$0x1] %v99_v31 }

// kernel: tile.22
= control target key start
LH: loop header
LB: loop body
LE: loop exit
PB: predicated region body
PF: predicated region fallthrough
CT: control target
= control target key end

     0   :  { %s28_s0 = inlined_call_operand.vmem [shape: f32[4], index: 0, kind: input, shape index: {}]   ;;  %s29_s1 = inlined_call_operand.vmem [shape: f32[16,4], index: 1, kind: output, shape index: {}]  }
   0x1   :  { %v4_v0 = vld [vmem:[%s28_s0] ss:$0 sm:$0xff] }
   0x2   :  { %5 = vst [vmem:[%s29_s1] sm:$0xff] %v4_v0  ;;  %8 = vst [vmem:[%s29_s1 + $0x8] sm:$0xff] %v4_v0 }

// kernel: tile.23
= control target key start
LH: loop header
LB: loop body
LE: loop exit
PB: predicated region body
PF: predicated region fallthrough
CT: control target
= control target key end

     0   :  { %s133_s10 = smov 60   ;;  %s134_s11 = smov 52   ;;  %vm3_vm0 = vcmask 31744   ;;  %vm9_vm1 = vcmask 523744   ;;  %vm15_vm2 = vcmask 490944   ;;  %vm21_vm3 = vcmask 458144   ;;  %s209_s0 = inlined_call_operand.vmem [shape: f32[16,4], index: 0, kind: input, shape index: {}]   ;;  %s210_s1 = inlined_call_operand.vmem [shape: f32[1,64], index: 1, kind: output, shape index: {}]  }
   0x1   :  { %v103_v0 = vld [vmem:[%s209_s0 + $0xf] sm:$0x1]   ;;  %v105_v1 = vld [vmem:[%s209_s0 + $0xd] sm:$0x1]   ;;  %v104_v2 = vld [vmem:[%s209_s0 + $0xe] sm:$0x1]  }
   0x2   :  { %7 = vrot.lane.b32.xlu0 %v103_v0, %s133_s10  ;;  %19 = vrot.lane.b32.xlu1 %v105_v1, %s134_s11  ;;  %v106_v3 = vld [vmem:[%s209_s0 + $0xc] sm:$0x1]   ;;  %s135_s16 = smov 56   ;;  %s136_s17 = smov 48   ;;  %v107_v4 = vld [vmem:[%s209_s0 + $0xb] sm:$0x1]  }
   0x3   :  { %v108_v5 = vld [vmem:[%s209_s0 + $0xa] sm:$0x1]   ;;  %v2_v6 = vld [vmem:[%s209_s0] sm:$0x1]   ;;  %s137_s24 = smov 44   ;;  %s138_s25 = smov 40  }
   0x4   :  { %4 = vst.msk [vmem:[#allocation0] sm:$0x1] %vm3_vm0, %v2_v6   ;;  %v109_v7 = vld [vmem:[%s209_s0 + $0x9] sm:$0x1]   ;;  %v110_v8 = vld [vmem:[%s209_s0 + $0x8] sm:$0x1]  }
   0x5   :  { %s139_s30 = smov 36   ;;  %s140_s2 = smov 32   ;;  %v111_v9 = vld [vmem:[%s209_s0 + $0x7] sm:$0x1]   ;;  %v112_v10 = vld [vmem:[%s209_s0 + $0x6] sm:$0x1]  }
   0x6   :  { %13 = vrot.lane.b32.xlu0 %v104_v2, %s135_s16  ;;  %25 = vrot.lane.b32.xlu1 %v106_v3, %s136_s17  ;;  %s141_s7 = smov 28   ;;  %s142_s8 = smov 24   ;;  %v113_v11 = vld [vmem:[%s209_s0 + $0x5] sm:$0x1]   ;;  %v114_v12 = vld [vmem:[%s209_s0 + $0x4] sm:$0x1]  }
   0x7   :  { %s143_s13 = smov 20   ;;  %s144_s14 = smov 16   ;;  %v115_v13 = vld [vmem:[%s209_s0 + $0x3] sm:$0x1]   ;;  %v116_v14 = vld [vmem:[%s209_s0 + $0x2] sm:$0x1]  }
   0x8   :  { %s145_s19 = smov 12   ;;  %s146_s20 = smov 8   ;;  %v117_v15 = vld [vmem:[%s209_s0 + $0x1] sm:$0x1]   ;;  %vm27_vm4 = vcmask 425344   ;;  %vm33_vm5 = vcmask 392544  }
   0x9   :  { %s147_s0 = smov 4   ;;  %vm39_vm6 = vcmask 359744   ;;  %vm45_vm7 = vcmask 326944   ;;  %vm51_vm8 = vcmask 294144   ;;  %vm57_vm9 = vcmask 261344  }
   0xa   :  { %31 = vrot.lane.b32.xlu0 %v107_v4, %s137_s24  ;;  %37 = vrot.lane.b32.xlu1 %v108_v5, %s138_s25  ;;  %vm63_vm10 = vcmask 228544   ;;  %vm69_vm11 = vcmask 195744   ;;  %vm75_vm12 = vcmask 162944   ;;  %vm81_vm13 = vcmask 130144  }
   0xb   :  { %vm87_vm14 = vcmask 97344   ;;  %vm93_vm15 = vcmask 64544  }
   0xe   :  { %43 = vrot.lane.b32.xlu0 %v109_v7, %s139_s30  ;;  %49 = vrot.lane.b32.xlu1 %v110_v8, %s140_s2 }
  0x12   :  { %55 = vrot.lane.b32.xlu0 %v111_v9, %s141_s7  ;;  %61 = vrot.lane.b32.xlu1 %v112_v10, %s142_s8 }
  0x16   :  { %67 = vrot.lane.b32.xlu0 %v113_v11, %s143_s13  ;;  %73 = vrot.lane.b32.xlu1 %v114_v12, %s144_s14 }
  0x1a   :  { %79 = vrot.lane.b32.xlu0 %v115_v13, %s145_s19  ;;  %85 = vrot.lane.b32.xlu1 %v116_v14, %s146_s20 }
  0x1e   :  { %91 = vrot.lane.b32.xlu0 %v117_v15, %s147_s0 }
  0x74   :  { %v8_v16 = vpop.permute.xlu0 %7   ;;  %v20_v17 = vpop.permute.xlu1 %19  }
  0x75   :  { %10 = vst.msk [vmem:[#allocation0] sm:$0x1] %vm9_vm1, %v8_v16  }
  0x78   :  { %v14_v18 = vpop.permute.xlu0 %13   ;;  %v26_v19 = vpop.permute.xlu1 %25  }
  0x79   :  { %16 = vst.msk [vmem:[#allocation0] sm:$0x1] %vm15_vm2, %v14_v18  }
  0x7a   :  { %22 = vst.msk [vmem:[#allocation0] sm:$0x1] %vm21_vm3, %v20_v17  }
  0x7b   :  { %28 = vst.msk [vmem:[#allocation0] sm:$0x1] %vm27_vm4, %v26_v19  }
  0x7c   :  { %v32_v20 = vpop.permute.xlu0 %31   ;;  %v38_v21 = vpop.permute.xlu1 %37  }
  0x7d   :  { %34 = vst.msk [vmem:[#allocation0] sm:$0x1] %vm33_vm5, %v32_v20  }
  0x7e   :  { %40 = vst.msk [vmem:[#allocation0] sm:$0x1] %vm39_vm6, %v38_v21  }
  0x80   :  { %v44_v22 = vpop.permute.xlu0 %43   ;;  %v50_v23 = vpop.permute.xlu1 %49  }
  0x81   :  { %46 = vst.msk [vmem:[#allocation0] sm:$0x1] %vm45_vm7, %v44_v22  }
  0x82   :  { %52 = vst.msk [vmem:[#allocation0] sm:$0x1] %vm51_vm8, %v50_v23  }
  0x84   :  { %v56_v24 = vpop.permute.xlu0 %55   ;;  %v62_v25 = vpop.permute.xlu1 %61  }
  0x85   :  { %58 = vst.msk [vmem:[#allocation0] sm:$0x1] %vm57_vm9, %v56_v24  }
  0x86   :  { %64 = vst.msk [vmem:[#allocation0] sm:$0x1] %vm63_vm10, %v62_v25  }
  0x88   :  { %v68_v26 = vpop.permute.xlu0 %67   ;;  %v74_v27 = vpop.permute.xlu1 %73  }
  0x89   :  { %70 = vst.msk [vmem:[#allocation0] sm:$0x1] %vm69_vm11, %v68_v26  }
  0x8a   :  { %76 = vst.msk [vmem:[#allocation0] sm:$0x1] %vm75_vm12, %v74_v27  }
  0x8c   :  { %v80_v28 = vpop.permute.xlu0 %79   ;;  %v86_v29 = vpop.permute.xlu1 %85  }
  0x8d   :  { %82 = vst.msk [vmem:[#allocation0] sm:$0x1] %vm81_vm13, %v80_v28  }
  0x8e   :  { %88 = vst.msk [vmem:[#allocation0] sm:$0x1] %vm87_vm14, %v86_v29  }
  0x90   :  { %v92_v30 = vpop.permute.xlu0 %91  }
  0x91   :  { %94 = vst.msk [vmem:[#allocation0] sm:$0x1] %vm93_vm15, %v92_v30  }
  0x98   :  { %v99_v31 = vld [vmem:[#allocation0] sm:$0x1] }
  0x99   :  { %102 = vst [vmem:[%s210_s1] sm:$0x1] %v99_v31 }

// kernel: _lambda_.1
= control target key start
LH: loop header
LB: loop body
LE: loop exit
PB: predicated region body
PF: predicated region fallthrough
CT: control target
= control target key end

     0   :  { %s2200_s17 = smov 0   ;;  %s2541_s0 = inlined_call_operand.vmem [shape: f32[2,16,64], index: 0, kind: input, shape index: {}]   ;;  %s2542_s1 = inlined_call_operand.vmem [shape: bf16[3,64,128], index: 1, kind: input, shape index: {}]   ;;  %s2543_s2 = inlined_call_operand.vmem [shape: f32[1,128], index: 2, kind: input, shape index: {}]   ;;  %s2544_s3 = inlined_call_operand.vmem [shape: bf16[3,128,128], index: 3, kind: input, shape index: {}]   ;;  %s2545_s4 = inlined_call_operand.vmem [shape: f32[1,128], index: 4, kind: input, shape index: {}]   ;;  %s2546_s5 = inlined_call_operand.vmem [shape: bf16[3,128,64], index: 5, kind: input, shape index: {}]   ;;  %s2547_s6 = inlined_call_operand.vmem [shape: f32[1,64], index: 6, kind: input, shape index: {}]   ;;  %s2548_s7 = inlined_call_operand.vmem [shape: f32[2,16,128], index: 7, kind: output, shape index: {0}]   ;;  %s2549_s8 = inlined_call_operand.vmem [shape: f32[2,16,128], index: 8, kind: output, shape index: {1}]   ;;  %s2550_s9 = inlined_call_operand.vmem [shape: f32[2,16,128], index: 9, kind: output, shape index: {2}]   ;;  %s2551_s10 = inlined_call_operand.vmem [shape: f32[2,16,128], index: 10, kind: output, shape index: {3}]   ;;  %s2552_s11 = inlined_call_operand.vmem [shape: f32[2,16,64], index: 11, kind: output, shape index: {4}]  }
   0x1 LB: > { %s1654_s18 = sadd.s32 4294967295, %s2136_s17   ;;  %p1658_p0 = scmp.ge.s32.totalorder %s2136_s17, 1  ;;  %s2136_s17 = sphi %s2200_s17, %s22_s17  }
   0x2   : > { %p346_p1 = scmp.lt.s32.totalorder %s2136_s17, 3 }
   0x4   : > { %p347_p2 = pnand %p1658_p0, %p346_p1 }
   0x5   : > { %p406_p3 = scmp.lt.s32.totalorder (!%p347_p2), %s1654_s18, 1 }
   0x6   : > { %350 = sbr.rel (%p347_p2) target bundleno = 764 (0x2fc), region = 48 }
   0xb   : > { %v2062_v0 = vld [vmem:[%s2542_s1 + $0x18] sm:$0xff]   ;;  %v2138_v1 = vmov 0.0   ;;  %v2064_v3 = vld [vmem:[%s2542_s1 + $0x10] sm:$0xff]   ;;  %vm2139_vm0 = vmmov 0   ;;  %s2558_s18 = smov (!%p406_p3, %s1654_s18), 1  ;;  %v2066_v5 = vld [vmem:[%s2542_s1 + $0x8] sm:$0xff]   ;;  %v439_v36 = vlaneseq }
   0xc   : > { %1896 = vmatprep.subr.bf16.mxu0 %v2138_v1  ;;  %1908 = vmatprep.subr.bf16.mxu1 %v2138_v1  ;;  %v2063_v2 = vld [vmem:[%s2542_s1 + $0x38] sm:$0xff]   ;;  %v2065_v4 = vld [vmem:[%s2542_s1 + $0x30] sm:$0xff]   ;;  %s2231_s29 = sshll.u32 %s2558_s18, 4  ;;  %v2067_v6 = vld [vmem:[%s2542_s1 + $0x28] sm:$0xff]   ;;  %vm503_vm1 = vcmask 523264   ;;  %vm698_vm2 = vcmask 1040384  }
   0xd   : > { %1897 = vmatpush3.bf16.msra.mxu0 %v2062_v0  ;;  %1904 = vmatprep.mubr.msk.bf16.mxu0 %vm2139_vm0, %v2138_v1  ;;  %s410_s15 = scalar_lea.vmem %s2541_s0, %s2231_s29  ;;  %v2068_v7 = vld [vmem:[%s2542_s1] sm:$0xff]   ;;  %v2070_v11 = vld [vmem:[%s2542_s1 + $0x58] sm:$0xff]   ;;  %v2071_v13 = vld [vmem:[%s2542_s1 + $0x50] sm:$0xff]   ;;  %v440_v41 = vshrl.u32 %v439_v36, 7  ;;  %vm707_vm4 = vcmask 1046528   ;;  %s415_s13 = scalar_lea.vmem %s2548_s7, %s2231_s29 }
   0xe   : > { %1898 = vmatprep.subr.bf16.mxu0 %v2138_v1  ;;  %1909 = vmatpush3.bf16.msra.mxu1 %v2063_v2  ;;  %v437_v8 = vld [vmem:[%s410_s15] sm:$0xff]  ;;  %v438_v9 = vld [vmem:[%s410_s15 + $0x8] sm:$0xff]  ;;  %v2074_v16 = vld [vmem:[%s2544_s3 + $0x38] sm:$0xff]   ;;  %s420_s16 = scalar_lea.vmem %s2549_s8, %s2231_s29  ;;  %s425_s18 = scalar_lea.vmem %s2550_s9, %s2231_s29 }
   0xf   : > { %1910 = vmatprep.subr.bf16.mxu1 %v2138_v1  ;;  %1916 = vmatprep.mubr.msk.bf16.mxu1 %vm2139_vm0, %v2138_v1  ;;  %v2069_v10 = vld [vmem:[%s2542_s1 + $0x20] sm:$0xff]   ;;  %v470_v12 = vpack.c.bf16 %v438_v9, %v437_v8  ;;  %v2072_v14 = vld [vmem:[%s2542_s1 + $0x48] sm:$0xff]   ;;  %v2075_v17 = vld [vmem:[%s2544_s3 + $0x78] sm:$0xff]   ;;  %v446_v43 = vand.u32 15, %v440_v41  ;;  %v441_v44 = vadd.s32 8, %v440_v41  ;;  %s430_s22 = scalar_lea.vmem %s2551_s10, %s2231_s29  ;;  %s435_s26 = scalar_lea.vmem %s2552_s11, %s2231_s29 }
  0x10   : > { %v2073_v15 = vld [vmem:[%s2542_s1 + $0x40] sm:$0xff]   ;;  %v2076_v18 = vld [vmem:[%s2544_s3 + $0x30] sm:$0xff]   ;;  %v2078_v20 = vld [vmem:[%s2544_s3 + $0x28] sm:$0xff]  }
  0x11   : > { %1899 = vmatpush3.bf16.msra.mxu0 %v2064_v3  ;;  %v2077_v19 = vld [vmem:[%s2544_s3 + $0x70] sm:$0xff]   ;;  %v2079_v21 = vld [vmem:[%s2544_s3 + $0x68] sm:$0xff]   ;;  %v2080_v22 = vld [vmem:[%s2544_s3 + $0x20] sm:$0xff]   ;;  %vm2341_vm3 = vcmp.eq.s32.totalorder %v446_v43, 0  ;;  %v453_v49 = vand.u32 15, %v441_v44 }
  0x12   : > { %1900 = vmatprep.subr.bf16.mxu0 %v2138_v1  ;;  %1911 = vmatpush3.bf16.msra.mxu1 %v2065_v4  ;;  %v2081_v23 = vld [vmem:[%s2544_s3 + $0x60] sm:$0xff]   ;;  %v2082_v24 = vld [vmem:[%s2544_s3 + $0x18] sm:$0xff]   ;;  %v2084_v26 = vld [vmem:[%s2544_s3 + $0x10] sm:$0xff]  }
  0x13   : > { %1912 = vmatprep.subr.bf16.mxu1 %v2138_v1  ;;  %v2083_v25 = vld [vmem:[%s2544_s3 + $0x58] sm:$0xff]   ;;  %v2085_v27 = vld [vmem:[%s2544_s3 + $0x50] sm:$0xff]   ;;  %v2086_v28 = vld [vmem:[%s2544_s3 + $0x8] sm:$0xff]   ;;  %vm2349_vm5 = vcmp.eq.s32.totalorder %v453_v49, 15 }
  0x14   : > { %v2087_v29 = vld [vmem:[%s2544_s3 + $0x48] sm:$0xff]   ;;  %v2088_v30 = vld [vmem:[%s2544_s3] sm:$0xff]   ;;  %v2091_v9 = vld [vmem:[%s2544_s3 + $0xb0] sm:$0xff]  }
  0x15   : > { %1901 = vmatpush3.bf16.msra.mxu0 %v2066_v5  ;;  %v2089_v31 = vld [vmem:[%s2544_s3 + $0x40] sm:$0xff]  }
  0x16   : > { %1902 = vmatprep.subr.bf16.mxu0 %v2138_v1  ;;  %1913 = vmatpush3.bf16.msra.mxu1 %v2067_v6  ;;  %v1702_v62 = vld [vmem:[%s2543_s2] ss:$0 sm:$0xff] }
  0x17   : > { %1914 = vmatprep.subr.bf16.mxu1 %v2138_v1 }
  0x19   : > { %1903 = vmatpush3.bf16.msra.mxu0 %v2068_v7  ;;  %v2090_v7 = vld [vmem:[%s2544_s3 + $0xb8] sm:$0xff]  }
  0x1a   : > { %1915 = vmatpush3.bf16.msra.mxu1 %v2069_v10  ;;  %1920 = vmatprep.subr.bf16.mxu0 %v2138_v1  ;;  %v2092_v10 = vld [vmem:[%s2544_s3 + $0xa8] sm:$0xff]  }
  0x1b   : > { %1932 = vmatprep.subr.bf16.mxu1 %v2138_v1 }
  0x1c   : > { %1905 = vmatmul.mubr.msk.bf16.vlgmr.msra.gmra.mxu0 %vm503_vm1, %v470_v12 }
  0x1d   : > { %1921 = vmatpush3.bf16.msra.mxu0 %v2070_v11  ;;  %1917 = vmatmul.mubr.msk.bf16.vlgmr.msra.gmra.mxu1 %vm503_vm1, %v470_v12  ;;  %v2093_v11 = vld [vmem:[%s2544_s3 + $0xa0] sm:$0xff]  }
  0x1e   : > { %1922 = vmatprep.subr.bf16.mxu0 %v2138_v1  ;;  %1928 = vmatprep.mubr.msk.bf16.mxu0 %vm2139_vm0, %v2138_v1 }
  0x1f   : > { %1948 = vmatprep.mubr.msk.bf16.mxu1 %vm2139_vm0, %v2138_v1  ;;  %1933 = vmatpush3.bf16.msra.mxu1 %v2074_v16  ;;  %v2098_v16 = vld [vmem:[%s2546_s5 + $0x38] sm:$0xff]  }
  0x20   : > { %1934 = vmatprep.subr.bf16.mxu1 %v2138_v1 }
  0x21   : > { %1923 = vmatpush3.bf16.msra.mxu0 %v2071_v13  ;;  %v2095_v13 = vld [vmem:[%s2544_s3 + $0x90] sm:$0xff]  }
  0x22   : > { %1924 = vmatprep.subr.bf16.mxu0 %v2138_v1 }
  0x23   : > { %1935 = vmatpush3.bf16.msra.mxu1 %v2076_v18  ;;  %v2100_v18 = vld [vmem:[%s2546_s5 + $0x30] sm:$0xff]  }
  0x24   : > { %1936 = vmatprep.subr.bf16.mxu1 %v2138_v1 }
  0x25   : > { %1925 = vmatpush3.bf16.msra.mxu0 %v2072_v14  ;;  %v2096_v14 = vld [vmem:[%s2544_s3 + $0x88] sm:$0xff]  }
  0x26   : > { %1926 = vmatprep.subr.bf16.mxu0 %v2138_v1 }
  0x27   : > { %1937 = vmatpush3.bf16.msra.mxu1 %v2078_v20  ;;  %v2102_v20 = vld [vmem:[%s2546_s5 + $0x28] sm:$0xff]  }
  0x28   : > { %1938 = vmatprep.subr.bf16.mxu1 %v2138_v1 }
  0x29   : > { %1927 = vmatpush3.bf16.msra.mxu0 %v2073_v15  ;;  %v2097_v15 = vld [vmem:[%s2544_s3 + $0x80] sm:$0xff]  }
  0x2a   : > { %1952 = vmatprep.subr.bf16.mxu0 %v2138_v1 }
  0x2b   : > { %1939 = vmatpush3.bf16.msra.mxu1 %v2080_v22  ;;  %v2104_v22 = vld [vmem:[%s2546_s5 + $0x20] sm:$0xff]  }
  0x2c   : > { %1929 = vmatmul.mubr.msk.bf16.vlgmr.msra.gmra.mxu0 %vm503_vm1, %v470_v12  ;;  %1940 = vmatprep.subr.bf16.mxu1 %v2138_v1  ;;  %v2094_v12 = vld [vmem:[%s2544_s3 + $0x98] sm:$0xff]  }
  0x2d   : > { %1968 = vmatprep.mubr.msk.bf16.mxu0 %vm2139_vm0, %v2138_v1  ;;  %1953 = vmatpush3.bf16.msra.mxu0 %v2075_v17  ;;  %v2099_v17 = vld [vmem:[%s2546_s5 + $0x78] sm:$0xff]  }
  0x2e   : > { %1954 = vmatprep.subr.bf16.mxu0 %v2138_v1 }
  0x2f   : > { %1941 = vmatpush3.bf16.msra.mxu1 %v2082_v24  ;;  %v2106_v24 = vld [vmem:[%s2546_s5 + $0x18] sm:$0xff]  }
  0x30   : > { %1942 = vmatprep.subr.bf16.mxu1 %v2138_v1 }
  0x31   : > { %1955 = vmatpush3.bf16.msra.mxu0 %v2077_v19  ;;  %v2101_v19 = vld [vmem:[%s2546_s5 + $0x70] sm:$0xff]  }
  0x32   : > { %1956 = vmatprep.subr.bf16.mxu0 %v2138_v1 }
  0x33   : > { %1943 = vmatpush3.bf16.msra.mxu1 %v2084_v26  ;;  %v2108_v26 = vld [vmem:[%s2546_s5 + $0x10] sm:$0xff]  }
  0x34   : > { %1944 = vmatprep.subr.bf16.mxu1 %v2138_v1 }
  0x35   : > { %1957 = vmatpush3.bf16.msra.mxu0 %v2079_v21  ;;  %v2103_v21 = vld [vmem:[%s2546_s5 + $0x68] sm:$0xff]  }
  0x36   : > { %1958 = vmatprep.subr.bf16.mxu0 %v2138_v1 }
  0x37   : > { %1945 = vmatpush3.bf16.msra.mxu1 %v2086_v28  ;;  %v2110_v28 = vld [vmem:[%s2546_s5 + $0x8] sm:$0xff]  }
  0x38   : > { %1946 = vmatprep.subr.bf16.mxu1 %v2138_v1 }
  0x39   : > { %1959 = vmatpush3.bf16.msra.mxu0 %v2081_v23  ;;  %v2105_v23 = vld [vmem:[%s2546_s5 + $0x60] sm:$0xff]  }
  0x3a   : > { %1960 = vmatprep.subr.bf16.mxu0 %v2138_v1 }
  0x3b   : > { %1947 = vmatpush3.bf16.msra.mxu1 %v2088_v30  ;;  %v2112_v30 = vld [vmem:[%s2546_s5] sm:$0xff]  }
  0x3c   : > { %1972 = vmatprep.subr.bf16.mxu1 %v2138_v1 }
  0x3d   : > { %1961 = vmatpush3.bf16.msra.mxu0 %v2083_v25  ;;  %v2107_v25 = vld [vmem:[%s2546_s5 + $0x58] sm:$0xff]  }
  0x3e   : > { %1962 = vmatprep.subr.bf16.mxu0 %v2138_v1 }
  0x41   : > { %1963 = vmatpush3.bf16.msra.mxu0 %v2085_v27  ;;  %v2109_v27 = vld [vmem:[%s2546_s5 + $0x50] sm:$0xff]  }
  0x42   : > { %1964 = vmatprep.subr.bf16.mxu0 %v2138_v1 }
  0x45   : > { %1965 = vmatpush3.bf16.msra.mxu0 %v2087_v29  ;;  %v2111_v29 = vld [vmem:[%s2546_s5 + $0x48] sm:$0xff]  }
  0x46   : > { %1966 = vmatprep.subr.bf16.mxu0 %v2138_v1 }
  0x49   : > { %1967 = vmatpush3.bf16.msra.mxu0 %v2089_v31  ;;  %v2113_v31 = vld [vmem:[%s2546_s5 + $0x40] sm:$0xff]  }
  0x4a   : > { %1992 = vmatprep.subr.bf16.mxu0 %v2138_v1 }
  0xdc   : > { %v541_v32 = vpop.f32.mrf.mxu0 }
  0xdd   : > { %v615_v33 = vpop.f32.mrf.mxu1  ;;  %v699_v42 = vrot.slane %v541_v32, 7 }
  0xde   : > { %v1906_v34 = vpop.f32.mrf.mxu0 }
  0xdf   : > { %v1918_v35 = vpop.f32.mrf.mxu1  ;;  %v704_v46 = vsel %vm698_vm2, 0.0, %v699_v42 }
  0xe0   : > { %v544_v37 = vpop.f32.mrf.mxu0  ;;  %v718_v51 = vsel %vm2341_vm3, 0.0, %v704_v46 }
  0xe1   : > { %v618_v38 = vpop.f32.mrf.mxu1  ;;  %v700_v47 = vrot.slane %v544_v37, 7  ;;  %v720_v57 = vadd.f32 %v718_v51, %v615_v33 }
  0xe2   : > { %v1907_v39 = vpop.f32.mrf.mxu0 }
  0xe3   : > { %v1919_v40 = vpop.f32.mrf.mxu1  ;;  %v701_v52 = vsel %vm698_vm2, %v699_v42, %v700_v47 }
  0xe4   : > { %v721_v59 = vadd.f32 %v701_v52, %v618_v38 }
  0xec   : > { %v689_v48 = vpop.f32.mrf.mxu0 }
  0xed   : > { %v708_v54 = vrot.slane %v689_v48, 1 }
  0xee   : > { %v1930_v50 = vpop.f32.mrf.mxu0 }
  0xf0   : > { %v692_v53 = vpop.f32.mrf.mxu0 }
  0xf1   : > { %v709_v56 = vrot.slane %v692_v53, 1 }
  0xf2   : > { %v1931_v58 = vpop.f32.mrf.mxu0 }
  0xf3   : > { %v710_v60 = vsel %vm707_vm4, %v708_v54, %v709_v56  ;;  %v713_v61 = vsel %vm707_vm4, %v709_v56, 0.0 }
  0xf4   : > { %v727_v63 = vsel %vm2349_vm5, 0.0, %v713_v61  ;;  %v728_v0 = vadd.f32 %v720_v57, %v710_v60  ;;  %v1759_v57 = vld [vmem:[%s2545_s4] ss:$0 sm:$0xff] }
  0xf5   : > { %v729_v2 = vadd.f32 %v727_v63, %v721_v59 }
  0xf6   : > { %v737_v3 = vadd.f32 %v1702_v62, %v728_v0 }
  0xf7   : > { %v738_v4 = vadd.f32 %v1702_v62, %v729_v2  ;;  %v2114_v2 = vld [vmem:[%s2546_s5 + $0xb8] sm:$0xff]  }
  0xf8   : > { %739 = vst [vmem:[%s415_s13] sm:$0xff] %v737_v3  ;;  %v741_v5 = vmax.f32 %v737_v3, 0.0 }
  0xf9   : > { %740 = vst [vmem:[%s415_s13 + $0x8] sm:$0xff] %v738_v4  ;;  %v742_v6 = vmax.f32 %v738_v4, 0.0  ;;  %v2115_v4 = vld [vmem:[%s2546_s5 + $0xb0] sm:$0xff]  }
  0xfa   : > { %743 = vst [vmem:[%s420_s16] sm:$0xff] %v741_v5 }
  0xfb   : > { %744 = vst [vmem:[%s420_s16 + $0x8] sm:$0xff] %v742_v6  ;;  %v745_v8 = vpack.c.bf16 %v742_v6, %v741_v5  ;;  %v2116_v5 = vld [vmem:[%s2546_s5 + $0xa8] sm:$0xff]   ;;  %v2117_v6 = vld [vmem:[%s2546_s5 + $0xa0] sm:$0xff]  }
  0xfd   : > { %1949 = vmatmul.mubr.bf16.vlgmr.msra.gmra.mxu1 %v745_v8  ;;  %1969 = vmatmul.mubr.bf16.vlgmr.msra.gmra.mxu0 %v745_v8 }
  0xfe   : > { %1973 = vmatpush3.bf16.msra.mxu1 %v2090_v7  ;;  %1988 = vmatprep.mubr.msk.bf16.mxu1 %vm2139_vm0, %v2138_v1  ;;  %v2118_v7 = vld [vmem:[%s2546_s5 + $0x98] sm:$0xff]  }
  0xff   : > { %1974 = vmatprep.subr.bf16.mxu1 %v2138_v1  ;;  %2008 = vmatprep.mubr.msk.bf16.mxu0 %vm2139_vm0, %v2138_v1 }
 0x100   : > { %1993 = vmatpush3.bf16.msra.mxu0 %v2098_v16 }
 0x101   : > { %1994 = vmatprep.subr.bf16.mxu0 %v2138_v1 }
 0x102   : > { %1975 = vmatpush3.bf16.msra.mxu1 %v2091_v9  ;;  %v2120_v9 = vld [vmem:[%s2546_s5 + $0x88] sm:$0xff]  }
 0x103   : > { %1976 = vmatprep.subr.bf16.mxu1 %v2138_v1 }
 0x104   : > { %1995 = vmatpush3.bf16.msra.mxu0 %v2100_v18 }
 0x105   : > { %1996 = vmatprep.subr.bf16.mxu0 %v2138_v1 }
 0x106   : > { %1977 = vmatpush3.bf16.msra.mxu1 %v2092_v10  ;;  %v2121_v10 = vld [vmem:[%s2546_s5 + $0x80] sm:$0xff]  }
 0x107   : > { %1978 = vmatprep.subr.bf16.mxu1 %v2138_v1 }
 0x108   : > { %1997 = vmatpush3.bf16.msra.mxu0 %v2102_v20 }
 0x109   : > { %1998 = vmatprep.subr.bf16.mxu0 %v2138_v1 }
 0x10a   : > { %1979 = vmatpush3.bf16.msra.mxu1 %v2093_v11 }
 0x10b   : > { %1980 = vmatprep.subr.bf16.mxu1 %v2138_v1 }
 0x10c   : > { %1999 = vmatpush3.bf16.msra.mxu0 %v2104_v22 }
 0x10d   : > { %2000 = vmatprep.subr.bf16.mxu0 %v2138_v1 }
 0x10e   : > { %1981 = vmatpush3.bf16.msra.mxu1 %v2094_v12 }
 0x10f   : > { %1982 = vmatprep.subr.bf16.mxu1 %v2138_v1 }
 0x110   : > { %2001 = vmatpush3.bf16.msra.mxu0 %v2106_v24 }
 0x111   : > { %2002 = vmatprep.subr.bf16.mxu0 %v2138_v1 }
 0x112   : > { %1983 = vmatpush3.bf16.msra.mxu1 %v2095_v13 }
 0x113   : > { %1984 = vmatprep.subr.bf16.mxu1 %v2138_v1 }
 0x114   : > { %2003 = vmatpush3.bf16.msra.mxu0 %v2108_v26 }
 0x115   : > { %2004 = vmatprep.subr.bf16.mxu0 %v2138_v1 }
 0x116   : > { %1985 = vmatpush3.bf16.msra.mxu1 %v2096_v14 }
 0x117   : > { %1986 = vmatprep.subr.bf16.mxu1 %v2138_v1 }
 0x118   : > { %2005 = vmatpush3.bf16.msra.mxu0 %v2110_v28 }
 0x119   : > { %2006 = vmatprep.subr.bf16.mxu0 %v2138_v1 }
 0x11a   : > { %1987 = vmatpush3.bf16.msra.mxu1 %v2097_v15 }
 0x11b   : > { %2012 = vmatprep.subr.bf16.mxu1 %v2138_v1 }
 0x11c   : > { %2007 = vmatpush3.bf16.msra.mxu0 %v2112_v30 }
 0x11d   : > { %1989 = vmatmul.mubr.bf16.vlgmr.msra.gmra.mxu1 %v745_v8  ;;  %2032 = vmatprep.subr.bf16.mxu0 %v2138_v1  ;;  %v2119_v8 = vld [vmem:[%s2546_s5 + $0x90] sm:$0xff]  }
 0x11e   : > { %2028 = vmatprep.mubr.msk.bf16.mxu1 %vm2139_vm0, %v2138_v1  ;;  %2013 = vmatpush3.bf16.msra.mxu1 %v2099_v17 }
 0x11f   : > { %2014 = vmatprep.subr.bf16.mxu1 %v2138_v1 }
 0x122   : > { %2015 = vmatpush3.bf16.msra.mxu1 %v2101_v19 }
 0x123   : > { %2016 = vmatprep.subr.bf16.mxu1 %v2138_v1 }
 0x126   : > { %2017 = vmatpush3.bf16.msra.mxu1 %v2103_v21 }
 0x127   : > { %2018 = vmatprep.subr.bf16.mxu1 %v2138_v1 }
 0x12a   : > { %2019 = vmatpush3.bf16.msra.mxu1 %v2105_v23 }
 0x12b   : > { %2020 = vmatprep.subr.bf16.mxu1 %v2138_v1 }
 0x12e   : > { %2021 = vmatpush3.bf16.msra.mxu1 %v2107_v25 }
 0x12f   : > { %2022 = vmatprep.subr.bf16.mxu1 %v2138_v1 }
 0x132   : > { %2023 = vmatpush3.bf16.msra.mxu1 %v2109_v27 }
 0x133   : > { %2024 = vmatprep.subr.bf16.mxu1 %v2138_v1 }
 0x136   : > { %2025 = vmatpush3.bf16.msra.mxu1 %v2111_v29 }
 0x137   : > { %2026 = vmatprep.subr.bf16.mxu1 %v2138_v1 }
 0x13a   : > { %2027 = vmatpush3.bf16.msra.mxu1 %v2113_v31 }
 0x1bd   : > { %v844_v32 = vpop.f32.mrf.mxu1  ;;  %v950_v33 = vpop.f32.mrf.mxu0 }
 0x1be   : > { %v1065_v40 = vrot.slane %v844_v32, 7 }
 0x1bf   : > { %v1950_v34 = vpop.f32.mrf.mxu1  ;;  %v1970_v35 = vpop.f32.mrf.mxu0 }
 0x1c0   : > { %v1070_v41 = vsel %vm698_vm2, 0.0, %v1065_v40 }
 0x1c1   : > { %v847_v36 = vpop.f32.mrf.mxu1  ;;  %v953_v37 = vpop.f32.mrf.mxu0  ;;  %v1079_v46 = vsel %vm2341_vm3, 0.0, %v1070_v41 }
 0x1c2   : > { %v1066_v42 = vrot.slane %v847_v36, 7  ;;  %v1081_v51 = vadd.f32 %v1079_v46, %v950_v33  ;;  %v1816_v33 = vld [vmem:[%s2547_s6] ss:$0 sm:$0xff] }
 0x1c3   : > { %v1951_v38 = vpop.f32.mrf.mxu1  ;;  %v1971_v39 = vpop.f32.mrf.mxu0 }
 0x1c4   : > { %v1067_v47 = vsel %vm698_vm2, %v1065_v40, %v1066_v42 }
 0x1c5   : > { %v1082_v53 = vadd.f32 %v1067_v47, %v953_v37 }
 0x1dd   : > { %v1056_v43 = vpop.f32.mrf.mxu1 }
 0x1de   : > { %v1073_v49 = vrot.slane %v1056_v43, 1 }
 0x1df   : > { %v1990_v44 = vpop.f32.mrf.mxu1 }
 0x1e1   : > { %v1059_v48 = vpop.f32.mrf.mxu1 }
 0x1e2   : > { %v1074_v50 = vrot.slane %v1059_v48, 1 }
 0x1e3   : > { %v1991_v52 = vpop.f32.mrf.mxu1 }
 0x1e4   : > { %v1075_v54 = vsel %vm707_vm4, %v1073_v49, %v1074_v50  ;;  %v1078_v56 = vsel %vm707_vm4, %v1074_v50, 0.0 }
 0x1e5   : > { %v1084_v58 = vsel %vm2349_vm5, 0.0, %v1078_v56  ;;  %v1085_v59 = vadd.f32 %v1081_v51, %v1075_v54 }
 0x1e6   : > { %v1086_v60 = vadd.f32 %v1084_v58, %v1082_v53 }
 0x1e7   : > { %v1094_v61 = vadd.f32 %v1759_v57, %v1085_v59 }
 0x1e8   : > { %v1095_v62 = vadd.f32 %v1759_v57, %v1086_v60 }
 0x1e9   : > { %1096 = vst [vmem:[%s425_s18] sm:$0xff] %v1094_v61  ;;  %v1098_v63 = vmax.f32 %v1094_v61, 0.0 }
 0x1ea   : > { %1097 = vst [vmem:[%s425_s18 + $0x8] sm:$0xff] %v1095_v62  ;;  %v1099_v0 = vmax.f32 %v1095_v62, 0.0 }
 0x1eb   : > { %1100 = vst [vmem:[%s430_s22] sm:$0xff] %v1098_v63 }
 0x1ec   : > { %1101 = vst [vmem:[%s430_s22 + $0x8] sm:$0xff] %v1099_v0  ;;  %v1102_v3 = vpack.c.bf16 %v1099_v0, %v1098_v63 }
 0x1ee   : > { %2009 = vmatmul.mubr.bf16.vlgmr.msra.gmra.mxu0 %v1102_v3  ;;  %2029 = vmatmul.mubr.bf16.vlgmr.msra.gmra.mxu1 %v1102_v3 }
 0x1ef   : > { %2033 = vmatpush3.bf16.msra.mxu0 %v2114_v2  ;;  %2048 = vmatprep.mubr.msk.bf16.mxu0 %vm2139_vm0, %v2138_v1 }
 0x1f0   : > { %2034 = vmatprep.subr.bf16.mxu0 %v2138_v1 }
 0x1f3   : > { %2035 = vmatpush3.bf16.msra.mxu0 %v2115_v4 }
 0x1f4   : > { %2036 = vmatprep.subr.bf16.mxu0 %v2138_v1 }
 0x1f7   : > { %2037 = vmatpush3.bf16.msra.mxu0 %v2116_v5 }
 0x1f8   : > { %2038 = vmatprep.subr.bf16.mxu0 %v2138_v1 }
 0x1fb   : > { %2039 = vmatpush3.bf16.msra.mxu0 %v2117_v6 }
 0x1fc   : > { %2040 = vmatprep.subr.bf16.mxu0 %v2138_v1 }
 0x1ff   : > { %2041 = vmatpush3.bf16.msra.mxu0 %v2118_v7 }
 0x200   : > { %2042 = vmatprep.subr.bf16.mxu0 %v2138_v1 }
 0x203   : > { %2043 = vmatpush3.bf16.msra.mxu0 %v2119_v8 }
 0x204   : > { %2044 = vmatprep.subr.bf16.mxu0 %v2138_v1 }
 0x207   : > { %2045 = vmatpush3.bf16.msra.mxu0 %v2120_v9 }
 0x208   : > { %2046 = vmatprep.subr.bf16.mxu0 %v2138_v1 }
 0x20b   : > { %2047 = vmatpush3.bf16.msra.mxu0 %v2121_v10 }
 0x20e   : > { %2049 = vmatmul.mubr.bf16.vlgmr.msra.gmra.mxu0 %v1102_v3 }
 0x2ae   : > { %v1201_v11 = vpop.f32.mrf.mxu0  ;;  %v1307_v12 = vpop.f32.mrf.mxu1 }
 0x2af   : > { %v1422_v19 = vrot.slane %v1201_v11, 7 }
 0x2b0   : > { %v2010_v13 = vpop.f32.mrf.mxu0  ;;  %v2030_v14 = vpop.f32.mrf.mxu1 }
 0x2b1   : > { %v1427_v20 = vsel %vm698_vm2, 0.0, %v1422_v19 }
 0x2b2   : > { %v1204_v15 = vpop.f32.mrf.mxu0  ;;  %v1310_v16 = vpop.f32.mrf.mxu1  ;;  %v1436_v24 = vsel %vm2341_vm3, 0.0, %v1427_v20 }
 0x2b3   : > { %v1423_v21 = vrot.slane %v1204_v15, 7  ;;  %v1438_v28 = vadd.f32 %v1436_v24, %v1307_v12 }
 0x2b4   : > { %v2011_v17 = vpop.f32.mrf.mxu0  ;;  %v2031_v18 = vpop.f32.mrf.mxu1 }
 0x2b5   : > { %v1424_v1 = vsel %vm698_vm2, %v1422_v19, %v1423_v21 }
 0x2b6   : > { %v1439_v30 = vadd.f32 %v1424_v1, %v1310_v16 }
 0x2ce   : > { %v1413_v22 = vpop.f32.mrf.mxu0 }
 0x2cf   : > { %v1430_v26 = vrot.slane %v1413_v22, 1 }
 0x2d0   : > { %v2050_v23 = vpop.f32.mrf.mxu0 }
 0x2d2   : > { %v1416_v25 = vpop.f32.mrf.mxu0 }
 0x2d3   : > { %v1431_v27 = vrot.slane %v1416_v25, 1 }
 0x2d4   : > { %v2051_v29 = vpop.f32.mrf.mxu0 }
 0x2d5   : > { %v1432_v31 = vsel %vm707_vm4, %v1430_v26, %v1431_v27  ;;  %v1435_v32 = vsel %vm707_vm4, %v1431_v27, 0.0 }
 0x2d6   : > { %v1441_v45 = vsel %vm2349_vm5, 0.0, %v1435_v32  ;;  %v1442_v34 = vadd.f32 %v1438_v28, %v1432_v31 }
 0x2d7   : > { %v1443_v35 = vadd.f32 %v1441_v45, %v1439_v30 }
 0x2d8   : > { %v1451_v36 = vadd.f32 %v1816_v33, %v1442_v34 }
 0x2d9   : > { %v1452_v37 = vadd.f32 %v1816_v33, %v1443_v35 }
 0x2da   : > { %v1817_v38 = vmul.f32 -1.442695, %v1451_v36 }
 0x2db   : > { %v1818_v39 = vmul.f32 -1.442695, %v1452_v37 }
 0x2dc   : > { %2122 = vpow2.f32 %v1817_v38 }
 0x2dd   : > { %2124 = vpow2.f32 %v1818_v39 }
 0x2e9   : > { %v2123_v40 = vpop.eup %2122 }
 0x2ea   : > { %v2125_v41 = vpop.eup %2124  ;;  %v1459_v42 = vadd.f32 1.0, %v2123_v40 }
 0x2eb   : > { %v1460_v43 = vadd.f32 1.0, %v2125_v41 }
 0x2ec   : > { %2126 = vrcp.f32 %v1459_v42 }
 0x2ed   : > { %2128 = vrcp.f32 %v1460_v43 }
 0x2f9   : > { %v2127_v55 = vpop.eup %2126 }
 0x2fa   : > { %v2129_v44 = vpop.eup %2128  ;;  %1465 = vst.msk [vmem:[%s435_s26] sm:$0xff] %vm503_vm1, %v2127_v55 }
 0x2fb   : > { %1466 = vst.msk [vmem:[%s435_s26 + $0x8] sm:$0xff] %vm503_vm1, %v2129_v44 }
 0x2fc PF: > { %s22_s17 = sadd.s32 1, %s2136_s17  }
 0x2fd   : > { %p19_p4 = scmp.ge.s32.totalorder %s22_s17, 4  }
 0x2ff   :  { %21 = sbr.rel (!%p19_p4) target bundleno = 1 (0x1), region = 132 }

</bundles_post_ra>
